<compile_context>
chip_gen: v7x
topology: tpu7x:2x2x1
jax: 0.10.0
libtpu: 0.0.40
codegen_flags: <defaults>
</compile_context>

<pallas_src>
import functools

import jax
import jax.numpy as jnp
import numpy as np
from jax import lax
from jax.experimental import pallas as pl
from jax.experimental.pallas import tpu as pltpu


def _spatial_attention_kernel(x_ref, t_ref, o_ref, sum_ref, max_ref, *, inv_c):
    # x_ref  : (Nb, Ct, HW) VMEM  — flat spatial maps, one (batch, channel) tile
    # t_ref  : (2, HW, HW)  VMEM  — full-spatial Toeplitz conv operators (avg, max)
    # o_ref  : (Nb, 1, HW)  VMEM  — lane-dense sigmoid(conv) output block
    # sum_ref, max_ref : (Nb, 1, HW) f32 VMEM scratch — running channel sum / max
    Nb, Ct, HW = x_ref.shape
    c_idx = pl.program_id(1)

    @pl.when(c_idx == 0)
    def _init():
        sum_ref[...] = jnp.zeros_like(sum_ref)
        max_ref[...] = jnp.full_like(max_ref, -jnp.inf)

    # Fused single pass over this channel tile: one load per channel feeds both
    # the running sum and the running max (halves VMEM read traffic vs mean+max).
    s = sum_ref[...]
    m = max_ref[...]
    for c in range(Ct):                                  # static unroll, Ct small
        xc = x_ref[:, c:c + 1, :].astype(jnp.float32)    # (Nb, 1, HW)
        s = s + xc
        m = jnp.maximum(m, xc)
    sum_ref[...] = s
    max_ref[...] = m

    # Last channel step: finish the mean, run the KxK conv as two MXU matmuls
    # against the precomputed Toeplitz operators, apply sigmoid, store lane-dense.
    @pl.when(c_idx == pl.num_programs(1) - 1)
    def _finalize():
        avg = sum_ref[:, 0, :] * inv_c                   # (Nb, HW); mul by 1/C
        mx = max_ref[:, 0, :]                            # (Nb, HW)
        acc = jnp.dot(avg, t_ref[0], preferred_element_type=jnp.float32)
        acc = acc + jnp.dot(mx, t_ref[1], preferred_element_type=jnp.float32)
        o_ref[:, 0, :] = jax.nn.sigmoid(acc).astype(o_ref.dtype)


def _build_toeplitz(weight, H, W):
    """(1, 2, K, K) conv weight -> (2, H*W, H*W) dense full-spatial Toeplitz
    operators: out_flat = in_flat @ T encodes the KxK conv including the
    implicit zero padding (out-of-range taps are simply absent)."""
    K = weight.shape[-1]
    P = (K - 1) // 2
    HW = H * W
    idx = jnp.arange(HW)
    h_in, w_in = (idx // W)[:, None], (idx % W)[:, None]      # (HW, 1)
    h_out, w_out = (idx // W)[None, :], (idx % W)[None, :]    # (1, HW)
    ki = h_in - h_out + P
    kj = w_in - w_out + P
    valid = (ki >= 0) & (ki < K) & (kj >= 0) & (kj < K)
    w2 = weight.reshape(2, K, K).astype(jnp.float32)
    taps = w2[:, jnp.clip(ki, 0, K - 1), jnp.clip(kj, 0, K - 1)]   # (2, HW, HW)
    return jnp.where(valid[None], taps, 0.0)


def _pick_c_tile(C, cap=32):
    """Channel tile: full C when small; otherwise a multiple of 8 dividing C."""
    if C <= cap:
        return C
    for ct in range(cap - cap % 8, 0, -8):
        if C % ct == 0:
            return ct
    return C  # fallback: full channel dim (always a legal block)


def _pick_n_block(N, bytes_per_element, target_bytes=1 << 20):
    """Batch elements per grid step: large enough to amortize per-step overhead,
    while keeping >=2 steps on the parallel axis (v7x megacore sharding)."""
    nb = max(1, min(N, target_bytes // max(bytes_per_element, 1)))
    if N >= 2:
        nb = max(1, min(nb, N // 2))
    while N % nb:
        nb -= 1
    return nb


def spatial_attention(x, weight, *, kernel_size=7):
    """x: (N, C, H, W), weight: (1, 2, K, K) -> (N, 1, H, W)."""
    assert kernel_size in (3, 7)
    N, C, H, W = x.shape
    K = kernel_size
    assert weight.shape == (1, 2, K, K)
    HW = H * W

    t_bytes = 2 * HW * HW * 4
    if t_bytes > (8 << 20):
        raise NotImplementedError(
            "this Pallas kernel targets feature maps with H*W <= ~1024")

    t = _build_toeplitz(weight, H, W)        # (2, HW, HW) f32, built once in XLA
    x_flat = x.reshape(N, C, HW)             # free row-major metadata reshape

    c_tile = _pick_c_tile(C)
    n_block = _pick_n_block(N, c_tile * HW * 4)
    grid = (N // n_block, C // c_tile)       # batch (parallel), channels (reduction, last)

    # Explicit VMEM budget: double-buffered inputs + resident output + scratch.
    est = (2 * n_block * c_tile * HW * 4 + 2 * t_bytes
           + 2 * n_block * HW * x.dtype.itemsize + 2 * n_block * HW * 4)
    vmem_limit = int(min(max(32 << 20, 2 * est), 48 << 20))

    kernel = functools.partial(_spatial_attention_kernel, inv_c=1.0 / C)

    out_flat = pl.pallas_call(
        kernel,
        out_shape=jax.ShapeDtypeStruct((N, 1, HW), x.dtype),
        grid=grid,
        in_specs=[
            pl.BlockSpec((n_block, c_tile, HW), lambda n, c: (n, c, 0)),
            pl.BlockSpec((2, HW, HW), lambda n, c: (0, 0, 0)),
        ],
        out_specs=pl.BlockSpec((n_block, 1, HW), lambda n, c: (n, 0, 0)),
        scratch_shapes=[pltpu.VMEM((n_block, 1, HW), jnp.float32),
                        pltpu.VMEM((n_block, 1, HW), jnp.float32)],
        compiler_params=pltpu.CompilerParams(
            dimension_semantics=("parallel", "arbitrary"),
            vmem_limit_bytes=vmem_limit),
    )(x_flat, t)

    return out_flat.reshape(N, 1, H, W)


def _reference(x, weight):
    avg_out = jnp.mean(x, axis=1, keepdims=True)
    max_out = jnp.max(x, axis=1, keepdims=True)
    cat = jnp.concatenate([avg_out, max_out], axis=1)
    K = weight.shape[-1]
    P = (K - 1) // 2
    y = lax.conv_general_dilated(
        cat, weight, window_strides=(1, 1), padding=[(P, P), (P, P)],
        dimension_numbers=("NCHW", "OIHW", "NCHW"),
        precision=lax.Precision.HIGHEST)
    return jax.nn.sigmoid(y)


if __name__ == "__main__":
    key = jax.random.PRNGKey(0)
    kx, kw = jax.random.split(key)

    N, C, H, W = 2, 4, 16, 16
    K = 7

    x = jax.random.normal(kx, (N, C, H, W), dtype=jnp.float32)
    # PyTorch-style uniform init, bound = 1/sqrt(fan_in), no bias.
    fan_in = 2 * K * K
    bound = 1.0 / np.sqrt(fan_in)
    weight = jax.random.uniform(kw, (1, 2, K, K), jnp.float32, -bound, bound)

    out = jax.block_until_ready(spatial_attention(x, weight, kernel_size=K))
    ref = jax.block_until_ready(_reference(x, weight))

    assert out.shape == (N, 1, H, W)
    assert jnp.allclose(out, ref, atol=1e-5, rtol=1e-5), "mismatch vs reference"

    print("KERNEL_OK")
</pallas_src>

<mosaic_0001>
module attributes {stable_mosaic.version = 11 : i64} {
  func.func @_spatial_attention_kernel(%arg0: i32, %arg1: i32, %arg2: memref<1x4x256xf32, #tpu.memory_space<vmem>>, %arg3: memref<2x256x256xf32, #tpu.memory_space<vmem>>, %arg4: memref<1x1x256xf32, #tpu.memory_space<vmem>>, %arg5: memref<1x1x256xf32, #tpu.memory_space<vmem>>, %arg6: memref<1x1x256xf32, #tpu.memory_space<vmem>>) attributes {dimension_semantics = [#tpu.dimension_semantics<parallel>, #tpu.dimension_semantics<arbitrary>], iteration_bounds = array<i64: 2, 1>, scalar_prefetch = 0 : i64, scratch_operands = 2 : i64, tpu.core_type = #tpu.core_type<tc>, window_params = [{transform_indices = @transform_0, window_bounds = array<i64: 1, 4, 256>}, {pipeline_mode = #tpu.pipeline_mode<synchronous>, transform_indices = @transform_1, window_bounds = array<i64: 2, 256, 256>}, {transform_indices = @transform_2, window_bounds = array<i64: 1, 1, 256>}]} {
    %c0_i32 = arith.constant 0 : i32
    %0 = arith.cmpi eq, %arg1, %c0_i32 : i32
    %1 = arith.extui %0 : i1 to i32
    %c0_i32_0 = arith.constant 0 : i32
    %2 = arith.cmpi ne, %1, %c0_i32_0 : i32
    scf.if %2 {
      %cst = arith.constant 0.000000e+00 : f32
      %22 = vector.broadcast %cst : f32 to vector<1x1x256xf32>
      %c0_23 = arith.constant 0 : index
      %c0_24 = arith.constant 0 : index
      %c0_25 = arith.constant 0 : index
      %23 = vector.load %arg5[%c0_23, %c0_24, %c0_25] : memref<1x1x256xf32, #tpu.memory_space<vmem>>, vector<1x1x256xf32>
      tpu.vector_store %arg5[%c0_23, %c0_24, %c0_25], %22 {strides = array<i32>} : memref<1x1x256xf32, #tpu.memory_space<vmem>>, vector<1x1x256xf32>,
      %cst_26 = arith.constant 0xFF800000 : f32
      %24 = vector.broadcast %cst_26 : f32 to vector<1x1x256xf32>
      %c0_27 = arith.constant 0 : index
      %c0_28 = arith.constant 0 : index
      %c0_29 = arith.constant 0 : index
      %25 = vector.load %arg6[%c0_27, %c0_28, %c0_29] : memref<1x1x256xf32, #tpu.memory_space<vmem>>, vector<1x1x256xf32>
      tpu.vector_store %arg6[%c0_27, %c0_28, %c0_29], %24 {strides = array<i32>} : memref<1x1x256xf32, #tpu.memory_space<vmem>>, vector<1x1x256xf32>,
    } else {
    }
    %c0 = arith.constant 0 : index
    %c0_1 = arith.constant 0 : index
    %c0_2 = arith.constant 0 : index
    %3 = vector.load %arg5[%c0, %c0_1, %c0_2] : memref<1x1x256xf32, #tpu.memory_space<vmem>>, vector<1x1x256xf32>
    %c0_3 = arith.constant 0 : index
    %c0_4 = arith.constant 0 : index
    %c0_5 = arith.constant 0 : index
    %4 = vector.load %arg6[%c0_3, %c0_4, %c0_5] : memref<1x1x256xf32, #tpu.memory_space<vmem>>, vector<1x1x256xf32>
    %c0_6 = arith.constant 0 : index
    %c0_7 = arith.constant 0 : index
    %c0_8 = arith.constant 0 : index
    %5 = vector.load %arg2[%c0_6, %c0_7, %c0_8] : memref<1x4x256xf32, #tpu.memory_space<vmem>>, vector<1x1x256xf32>
    %6 = arith.addf %3, %5 : vector<1x1x256xf32>
    %7 = arith.maximumf %4, %5 : vector<1x1x256xf32>
    %c0_9 = arith.constant 0 : index
    %c1 = arith.constant 1 : index
    %c0_10 = arith.constant 0 : index
    %8 = vector.load %arg2[%c0_9, %c1, %c0_10] : memref<1x4x256xf32, #tpu.memory_space<vmem>>, vector<1x1x256xf32>
    %9 = arith.addf %6, %8 : vector<1x1x256xf32>
    %10 = arith.maximumf %7, %8 : vector<1x1x256xf32>
    %c0_11 = arith.constant 0 : index
    %c2 = arith.constant 2 : index
    %c0_12 = arith.constant 0 : index
    %11 = vector.load %arg2[%c0_11, %c2, %c0_12] : memref<1x4x256xf32, #tpu.memory_space<vmem>>, vector<1x1x256xf32>
    %12 = arith.addf %9, %11 : vector<1x1x256xf32>
    %13 = arith.maximumf %10, %11 : vector<1x1x256xf32>
    %c0_13 = arith.constant 0 : index
    %c3 = arith.constant 3 : index
    %c0_14 = arith.constant 0 : index
    %14 = vector.load %arg2[%c0_13, %c3, %c0_14] : memref<1x4x256xf32, #tpu.memory_space<vmem>>, vector<1x1x256xf32>
    %15 = arith.addf %12, %14 : vector<1x1x256xf32>
    %16 = arith.maximumf %13, %14 : vector<1x1x256xf32>
    %c0_15 = arith.constant 0 : index
    %c0_16 = arith.constant 0 : index
    %c0_17 = arith.constant 0 : index
    %17 = vector.load %arg5[%c0_15, %c0_16, %c0_17] : memref<1x1x256xf32, #tpu.memory_space<vmem>>, vector<1x1x256xf32>
    tpu.vector_store %arg5[%c0_15, %c0_16, %c0_17], %15 {strides = array<i32>} : memref<1x1x256xf32, #tpu.memory_space<vmem>>, vector<1x1x256xf32>,
    %c0_18 = arith.constant 0 : index
    %c0_19 = arith.constant 0 : index
    %c0_20 = arith.constant 0 : index
    %18 = vector.load %arg6[%c0_18, %c0_19, %c0_20] : memref<1x1x256xf32, #tpu.memory_space<vmem>>, vector<1x1x256xf32>
    tpu.vector_store %arg6[%c0_18, %c0_19, %c0_20], %16 {strides = array<i32>} : memref<1x1x256xf32, #tpu.memory_space<vmem>>, vector<1x1x256xf32>,
    %c0_i32_21 = arith.constant 0 : i32
    %19 = arith.cmpi eq, %arg1, %c0_i32_21 : i32
    %20 = arith.extui %19 : i1 to i32
    %c0_i32_22 = arith.constant 0 : i32
    %21 = arith.cmpi ne, %20, %c0_i32_22 : i32
    scf.if %21 {
      %c0_23 = arith.constant 0 : index
      %c0_24 = arith.constant 0 : index
      %c0_25 = arith.constant 0 : index
      %22 = vector.load %arg5[%c0_23, %c0_24, %c0_25] : memref<1x1x256xf32, #tpu.memory_space<vmem>>, vector<1x1x256xf32>
      %23 = vector.shape_cast %22 : vector<1x1x256xf32> to vector<1x256xf32>
      %cst = arith.constant 2.500000e-01 : f32
      %24 = vector.broadcast %cst : f32 to vector<1x256xf32>
      %25 = arith.mulf %23, %24 : vector<1x256xf32>
      %c0_26 = arith.constant 0 : index
      %c0_27 = arith.constant 0 : index
      %c0_28 = arith.constant 0 : index
      %26 = vector.load %arg6[%c0_26, %c0_27, %c0_28] : memref<1x1x256xf32, #tpu.memory_space<vmem>>, vector<1x1x256xf32>
      %27 = vector.shape_cast %26 : vector<1x1x256xf32> to vector<1x256xf32>
      %c0_29 = arith.constant 0 : index
      %c0_30 = arith.constant 0 : index
      %c0_31 = arith.constant 0 : index
      %28 = vector.load %arg3[%c0_29, %c0_30, %c0_31] : memref<2x256x256xf32, #tpu.memory_space<vmem>>, vector<1x256x256xf32>
      %29 = vector.shape_cast %28 : vector<1x256x256xf32> to vector<256x256xf32>
      %cst_32 = arith.constant dense<0.000000e+00> : vector<1x256xf32>
      %30 = tpu.matmul %25, %29, %cst_32 {dimension_numbers = #tpu.dot_dimension_numbers<[1], [0], [0], [1], [0, 0, 1, 1], [], []>} : vector<1x256xf32>, vector<256x256xf32>, vector<1x256xf32> -> vector<1x256xf32>
      %c1_33 = arith.constant 1 : index
      %c0_34 = arith.constant 0 : index
      %c0_35 = arith.constant 0 : index
      %31 = vector.load %arg3[%c1_33, %c0_34, %c0_35] : memref<2x256x256xf32, #tpu.memory_space<vmem>>, vector<1x256x256xf32>
      %32 = vector.shape_cast %31 : vector<1x256x256xf32> to vector<256x256xf32>
      %cst_36 = arith.constant dense<0.000000e+00> : vector<1x256xf32>
      %33 = tpu.matmul %27, %32, %cst_36 {dimension_numbers = #tpu.dot_dimension_numbers<[1], [0], [0], [1], [0, 0, 1, 1], [], []>} : vector<1x256xf32>, vector<256x256xf32>, vector<1x256xf32> -> vector<1x256xf32>
      %34 = arith.addf %30, %33 : vector<1x256xf32>
      %35 = arith.negf %34 : vector<1x256xf32>
      %36 = math.exp %35 : vector<1x256xf32>
      %cst_37 = arith.constant 1.000000e+00 : f32
      %37 = vector.broadcast %cst_37 : f32 to vector<1x256xf32>
      %38 = arith.addf %37, %36 : vector<1x256xf32>
      %39 = arith.divf %37, %38 : vector<1x256xf32>
      %c0_38 = arith.constant 0 : index
      %c0_39 = arith.constant 0 : index
      %c0_40 = arith.constant 0 : index
      %40 = vector.load %arg4[%c0_38, %c0_39, %c0_40] : memref<1x1x256xf32, #tpu.memory_space<vmem>>, vector<1x1x256xf32>
      %41 = vector.shape_cast %40 : vector<1x1x256xf32> to vector<1x256xf32>
      %42 = vector.shape_cast %39 : vector<1x256xf32> to vector<1x1x256xf32>
      tpu.vector_store %arg4[%c0_38, %c0_39, %c0_40], %42 {strides = array<i32>} : memref<1x1x256xf32, #tpu.memory_space<vmem>>, vector<1x1x256xf32>,
    } else {
    }
    return
  }
  func.func @transform_0(%arg0: i32, %arg1: i32) -> (i32, i32, i32) {
    %c0_i32 = arith.constant 0 : i32
    %c0_i32_0 = arith.constant 0 : i32
    return %arg0, %arg1, %c0_i32 : i32, i32, i32
  }
  func.func @transform_1(%arg0: i32, %arg1: i32) -> (i32, i32, i32) {
    %c0_i32 = arith.constant 0 : i32
    %c0_i32_0 = arith.constant 0 : i32
    %c0_i32_1 = arith.constant 0 : i32
    %c0_i32_2 = arith.constant 0 : i32
    return %c0_i32, %c0_i32_0, %c0_i32_1 : i32, i32, i32
  }
  func.func @transform_2(%arg0: i32, %arg1: i32) -> (i32, i32, i32) {
    %c0_i32 = arith.constant 0 : i32
    %c0_i32_0 = arith.constant 0 : i32
    %c0_i32_1 = arith.constant 0 : i32
    return %arg0, %c0_i32, %c0_i32_0 : i32, i32, i32
  }
}

</mosaic_0001>

<bundles_post_ra>
// kernel: tpu_custom_call.1
= control target key start
LH: loop header
LB: loop body
LE: loop exit
PB: predicated region body
PF: predicated region fallthrough
CT: control target
= control target key end

     0   :  { %7 = vsyncpa [#allocation5], 0  ;;  %s1311_s0 = inlined_call_operand.hbm [shape: f32[2,4,256], index: 0, kind: input, shape index: {}]   ;;  %s1312_s1 = inlined_call_operand.hbm [shape: f32[2,256,256], index: 1, kind: input, shape index: {}]   ;;  %s1313_s2 = inlined_call_operand.hbm [shape: f32[2,1,256], index: 2, kind: output, shape index: {}]  }
   0x1   :  { %9 = vsyncpa [#allocation5 + $0x1], 0 }
   0x2   :  { %10 = vsyncpa [#allocation8], 0 }
   0x3   :  { %11 = vsyncpa [#allocation6], 0 }
   0x4   :  { %13 = vsyncpa [#allocation6 + $0x1], 0  ;;  %s1069_s9 = smov 0   ;;  %s1071_s10 = smov 0  }
   0x5   :  { %s1073_s11 = smov 0   ;;  %s1075_s12 = smov 0  }
   0x6   :  { %s1077_s13 = smov 0   ;;  %s1079_s14 = smov 0  }
   0x7 LB: > { %s660_s15 = sadd.s32 4294967295, %s1044_s14   ;;  %s661_s16 = sadd.s32 4294967294, %s1044_s14   ;;  %s1044_s14 = sphi %s1079_s14, %s19_s14   ;;  %s1040_s13 = sphi %s1077_s13, %s1339_s13   ;;  %s1036_s12 = sphi %s1075_s12, %s1338_s12   ;;  %s1032_s11 = sphi %s1073_s11, %s1337_s11   ;;  %s1028_s10 = sphi %s1071_s10, %s1336_s10   ;;  %s1024_s9 = sphi %s1069_s9, %s1335_s9  }
   0x8   : > { %p53_p0 = scmp.ne.s32.totalorder %s1028_s10, %s1024_s9  ;;  %p1103_p1 = scmp.eq.s32.totalorder %s660_s15, 0 }
   0x9   : > { %p1107_p2 = scmp.eq.s32.totalorder %s660_s15, 1  ;;  %p104_p3 = scmp.eq.s32.totalorder %s661_s16, 1 }
   0xa   : > { %s1318_s17 = scalar_select %p1103_p1, 1, 0 }
   0xb   : > { %s1319_s18 = scalar_select %p1107_p2, 1, 0 }
   0xc   : > { %p1113_p4 = por %p1103_p1, %p53_p0  ;;  %p662_p5 = scmp.ge.s32.totalorder %s1044_s14, 1 }
   0xd   : > { %p1118_p6 = por %p104_p3, %p53_p0  ;;  %p111_p7 = scmp.lt.s32.totalorder %s1044_s14, 3 }
   0xe   : > { %s1320_s19 = scalar_select %p1113_p4, 1, 0 }
   0xf   : > { %s1321_s20 = scalar_select %p1118_p6, 1, 0 }
  0x10   : > { %p1123_p8 = pnand %p662_p5, %p111_p7  ;;  %s1046_s22 = smov [#allocation7]  }
  0x11   : > { %s123_s23 = sshll.u32 %s1046_s22, 4  ;;  %s31_s25 = sadd.s32 1, %s1040_s13  ;;  %s124_s23 = int_to_ptr.vmem [resolvable:$true] %s123_s23 }
  0x12   : > { %s1322_s21 = scalar_select %p1123_p8, 1, 0 }
  0x13   : > { %p822_p9 = pneg %p1123_p8  ;;  %s900_s28 = scalar_lea.hbm %s1312_s1, 16384 }
  0x14   : > { %p901_p12 = scmp.ne.s32.totalorder %s1312_s1, %s900_s28  ;;  %p907_p5 = scmp.lt.u32.totalorder %s900_s28, %s1312_s1 }
  0x15   : > { %p1132_p11 = pnand %p822_p9, %p1103_p1 }
  0x17   : > { %p902_p13 = pneg %p1132_p11 }
  0x19   : > { %p903_p0 = pnand %p902_p13, %p901_p12 }
  0x1b   : > { %p904_p3 = pneg %p903_p0 }
  0x1d   : > { %p909_p7 = pnand %p907_p5, %p904_p3 }
  0x1f   : > { %912 = shalt.err (!%p909_p7)
}
  0x20   : > { %s913_s5 = scalar_lea.vmem %s124_s23, 16384  ;;  %p921_p1 = scmp.lt.s32.totalorder %s124_s23, %s124_s23 }
  0x21   : > { %p914_p9 = scmp.ne.s32.totalorder %s124_s23, %s913_s5  ;;  %p922_p4 = scmp.lt.s32.totalorder %s913_s5, %s913_s5 }
  0x23   : > { %p916_p10 = pnand %p914_p9, %p902_p13  ;;  %p923_p8 = por %p922_p4, %p921_p1 }
  0x25   : > { %p917_p6 = pneg %p916_p10 }
  0x27   : > { %p924_p2 = pnand %p923_p8, %p917_p6 }
  0x29   : > { %927 = shalt.err (!%p924_p2)
}
  0x2a   : > { %s1047_s6 = smov 256   ;;  %s1048_s7 = smov 16  }
  0x2b   : > { %825 = dma.hbm_to_vmem [thread:$0]  (!%p1132_p11), %s1312_s1, 16384, %s124_s23, [#allocation8], %s1047_s6, %s1047_s6, %s1048_s7  }
  0x2c   : > { %p33_p1 = scmp.ge.s32.totalorder %s31_s25, 2  ;;  %s40_s16 = sadd.s32 1, %s1032_s11 }
  0x2d   : > { %p47_p2 = scmp.ne.s32.totalorder %s1032_s11, %s1028_s10  ;;  %p48_p4 = scmp.eq.s32.totalorder %s1044_s14, 0 }
  0x2e   : > { %s1341_s25 = smov (%p33_p1, %s31_s25), 0  ;;  %p1325_p8 = scmp.ne.s32.totalorder %s1319_s18, 0 }
  0x2f   : > { %p1159_p6 = por %p48_p4, %p47_p2  ;;  %s35_s24 = ssub.s32 %s1040_s13, %s1341_s25 }
  0x30   : > { %p1165_p10 = por %p1325_p8, %p47_p2  ;;  %p835_p12 = scmp.lt.s32.totalorder %s1044_s14, 2 }
  0x31   : > { %p38_p11 = scmp.eq.s32.totalorder %s35_s24, 0  ;;  %s137_s23 = sand.u32 1, %s1032_s11  }
  0x32   : > { %s665_s27 = sshll.u32 %s137_s23, 3  ;;  %s682_s29 = sshll.u32 %s1040_s13, 7 }
  0x33   : > { %s1174_s28 = scalar_select %p38_p11, %s1032_s11, %s40_s16  }
  0x34   : > { %s1180_s4 = scalar_lea.hbm %s1311_s0, %s682_s29  ;;  %s141_s18 = scalar_lea.vmem [#allocation4], %s665_s27 }
  0x35   : > { %s151_s5 = sshll.u32 %s141_s18, 4  ;;  %p1186_p13 = pnand %p835_p12, %p1159_p6  ;;  %s1182_s5 = int_to_ptr.vmem [resolvable:$true] %s151_s5 }
  0x36   : > { %s138_s7 = scalar_lea.sflag [#allocation5], %s137_s23  ;;  %s928_s8 = scalar_lea.hbm %s1180_s4, 128 }
  0x37   : > { %p929_p0 = scmp.ne.s32.totalorder %s1180_s4, %s928_s8  ;;  %p930_p3 = pneg %p1186_p13 }
  0x38   : > { %s933_s24 = scalar_lea.hbm %s1311_s0, 256  ;;  %p934_p9 = scmp.lt.u32.totalorder %s1180_s4, %s1311_s0 }
  0x39   : > { %p931_p5 = pnand %p930_p3, %p929_p0  ;;  %p935_p1 = scmp.lt.u32.totalorder %s933_s24, %s928_s8 }
  0x3a   : > { %p937_p4 = scmp.lt.u32.totalorder %s928_s8, %s1180_s4 }
  0x3b   : > { %p932_p7 = pneg %p931_p5  ;;  %p936_p2 = por %p935_p1, %p934_p9 }
  0x3d   : > { %p938_p6 = por %p937_p4, %p936_p2 }
  0x3f   : > { %p939_p8 = pnand %p938_p6, %p932_p7 }
  0x41   : > { %942 = shalt.err (!%p939_p8)
}
  0x42   : > { %s943_s23 = scalar_lea.vmem %s1182_s5, 128  ;;  %s1049_s29 = smov [#allocation4]  }
  0x43   : > { %p944_p12 = scmp.ne.s32.totalorder %s1182_s5, %s943_s23  ;;  %s948_s30 = sshll.u32 %s1049_s29, 4  ;;  %s949_s30 = int_to_ptr.vmem [resolvable:$false] %s948_s30 }
  0x44   : > { %s950_s3 = scalar_lea.vmem %s949_s30, 256  ;;  %p951_p5 = scmp.lt.s32.totalorder %s1182_s5, %s949_s30 }
  0x45   : > { %p946_p11 = pnand %p944_p12, %p930_p3  ;;  %p952_p9 = scmp.lt.s32.totalorder %s950_s3, %s943_s23 }
  0x47   : > { %p947_p0 = pneg %p946_p11  ;;  %p953_p1 = por %p952_p9, %p951_p5 }
  0x49   : > { %p954_p2 = pnand %p953_p1, %p947_p0 }
  0x4b   : > { %957 = shalt.err (!%p954_p2)
}
  0x4c   : > { %829 = dma.hbm_to_vmem [thread:$0]  (!%p1186_p13), %s1180_s4, 128, %s1182_s5, %s138_s7  }
  0x4d   : > { %p1328_p7 = scmp.ne.s32.totalorder %s1322_s21, 0 }
  0x4e   : > { %s1218_s18 = sand.u32 (!%p1328_p7), 1, %s1028_s10   ;;  %p1329_p3 = scmp.ne.s32.totalorder (!%p1328_p7), %s1320_s19, 0 }
  0x4f   : > { %160 = sbr.rel (%p1328_p7) target bundleno = 420 (0x1a4), region = 28  ;;  %s669_s8 = sshll.u32 (!%p1328_p7), %s1218_s18, 3 }
  0x50   : > { %s163_s15 = scalar_lea.sflag (!%p1328_p7), [#allocation5], %s1218_s18  ;;  %s1222_s16 = scalar_lea.vmem (!%p1328_p7), [#allocation4], %s669_s8 }
  0x56   : > { %1011 = dma.done.wait (%p1329_p3), %s163_s15, 128  }
  0x57   : > { %1013 = vsyncadd (%p1329_p3), %s163_s15, 4294967168  ;;  %p1330_p13 = scmp.ne.s32.totalorder %s1318_s17, 0 }
  0x59   : > { %1015 = dma.done.wait (%p1330_p13), [#allocation8], 16384  }
  0x5a   : > { %1017 = vsyncadd (%p1330_p13), [#allocation8], 4294950912  ;;  %v195_v0 = vlaneseq  ;;  %v1050_v2 = vmov 0.0   ;;  %v1051_v3 = vmov -inf   ;;  %v296_v4 = vld [vmem:[#allocation7 + $0x208] sm:$0xff]  ;;  %v298_v5 = vld [vmem:[#allocation7 + $0x218] sm:$0xff] }
  0x5b   : > { %v231_v6 = vld [vmem:[#allocation7 + $0x8] sm:$0xff]  ;;  %v684_v7 = vpack.c.bf16 %v298_v5, %v296_v4  ;;  %v233_v8 = vld [vmem:[#allocation7 + $0x18] sm:$0xff]  ;;  %v295_v9 = vld [vmem:[#allocation7 + $0x200] sm:$0xff]  ;;  %s671_s17 = sshll.u32 %s1218_s18, 1  ;;  %s683_s19 = sshll.u32 %s1036_s12, 5 }
  0x5c   : > { %vm1233_vm0 = vcmp.lt.s32.totalorder %v195_v0, 256  ;;  %v297_v10 = vld [vmem:[#allocation7 + $0x210] sm:$0xff]  ;;  %v748_v11 = vpack.c.bf16 %v233_v8, %v231_v6  ;;  %v230_v13 = vld [vmem:[#allocation7] sm:$0xff]  ;;  %v300_v15 = vld [vmem:[#allocation7 + $0x228] sm:$0xff]  ;;  %s190_s21 = scalar_lea.vmem [#allocation9], %s671_s17  ;;  %s1260_s7 = scalar_lea.hbm %s1313_s2, %s683_s19 }
  0x5d   : > { %199 = vst.msk [vmem:[#allocation2] sm:$0x3] %vm1233_vm0, %v1050_v2  ;;  %200 = vst.msk [vmem:[#allocation3] sm:$0x3] %vm1233_vm0, %v1051_v3  ;;  %v686_v12 = vpack.c.bf16 %v297_v10, %v295_v9  ;;  %v232_v14 = vld [vmem:[#allocation7 + $0x10] sm:$0xff]  ;;  %685 = vmatprep.subr.bf16.mxu1 %v684_v7  ;;  %v302_v17 = vld [vmem:[#allocation7 + $0x238] sm:$0xff] }
  0x5e   : > { %v750_v16 = vpack.c.bf16 %v232_v14, %v230_v13  ;;  %v235_v18 = vld [vmem:[#allocation7 + $0x28] sm:$0xff]  ;;  %v237_v19 = vld [vmem:[#allocation7 + $0x38] sm:$0xff]  ;;  %749 = vmatprep.subr.bf16.mxu0 %v748_v11  ;;  %v688_v20 = vpack.c.bf16 %v302_v17, %v300_v15  ;;  %v299_v22 = vld [vmem:[#allocation7 + $0x220] sm:$0xff]  ;;  %s569_s4 = sshll.u32 %s190_s21, 4  ;;  %s555_s24 = scalar_lea.sflag [#allocation6], %s1218_s18  ;;  %s1262_s4 = int_to_ptr.vmem [resolvable:$true] %s569_s4 }
  0x5f   : > { %687 = vmatpush1.bf16.msra.mxu1 %v686_v12  ;;  %v752_v21 = vpack.c.bf16 %v237_v19, %v235_v18  ;;  %v301_v23 = vld [vmem:[#allocation7 + $0x230] sm:$0xff]  ;;  %v234_v24 = vld [vmem:[#allocation7 + $0x20] sm:$0xff]  ;;  %v304_v27 = vld [vmem:[#allocation7 + $0x248] sm:$0xff]  ;;  %s958_s22 = scalar_lea.vmem %s1262_s4, 32  ;;  %s1053_s12 = smov [#allocation9]  }
  0x60   : > { %751 = vmatpush1.bf16.msra.mxu0 %v750_v16  ;;  %v690_v25 = vpack.c.bf16 %v301_v23, %v299_v22  ;;  %v236_v26 = vld [vmem:[#allocation7 + $0x30] sm:$0xff]  ;;  %v306_v28 = vld [vmem:[#allocation7 + $0x258] sm:$0xff]  ;;  %689 = vmatprep.subr.bf16.mxu1 %v688_v20  ;;  %v239_v31 = vld [vmem:[#allocation7 + $0x48] sm:$0xff]  ;;  %p959_p4 = scmp.ne.s32.totalorder %s1262_s4, %s958_s22  ;;  %s962_s27 = sshll.u32 %s1053_s12, 4  ;;  %s963_s27 = int_to_ptr.vmem [resolvable:$false] %s962_s27 }
  0x61   : > { %753 = vmatprep.subr.bf16.mxu0 %v752_v21  ;;  %v754_v29 = vpack.c.bf16 %v236_v26, %v234_v24  ;;  %v692_v30 = vpack.c.bf16 %v306_v28, %v304_v27  ;;  %v241_v32 = vld [vmem:[#allocation7 + $0x58] sm:$0xff]  ;;  %v303_v33 = vld [vmem:[#allocation7 + $0x240] sm:$0xff]  ;;  %v305_v35 = vld [vmem:[#allocation7 + $0x250] sm:$0xff]  ;;  %s964_s23 = scalar_lea.vmem %s963_s27, 64  ;;  %p965_p12 = scmp.lt.s32.totalorder %s1262_s4, %s963_s27 }
  0x62   : > { %v756_v34 = vpack.c.bf16 %v241_v32, %v239_v31  ;;  %v238_v36 = vld [vmem:[#allocation7 + $0x40] sm:$0xff]  ;;  %v240_v37 = vld [vmem:[#allocation7 + $0x50] sm:$0xff]  ;;  %v694_v38 = vpack.c.bf16 %v305_v35, %v303_v33  ;;  %v308_v39 = vld [vmem:[#allocation7 + $0x268] sm:$0xff]  ;;  %p960_p6 = pnand %p959_p4, %p1165_p10  ;;  %p966_p11 = scmp.lt.s32.totalorder %s964_s23, %s958_s22 }
  0x63   : > { %691 = vmatpush1.bf16.msra.mxu1 %v690_v25  ;;  %v310_v40 = vld [vmem:[#allocation7 + $0x278] sm:$0xff]  ;;  %v243_v41 = vld [vmem:[#allocation7 + $0x68] sm:$0xff]  ;;  %v758_v42 = vpack.c.bf16 %v240_v37, %v238_v36  ;;  %v307_v45 = vld [vmem:[#allocation7 + $0x260] sm:$0xff] }
  0x64   : > { %755 = vmatpush1.bf16.msra.mxu0 %v754_v29  ;;  %693 = vmatprep.subr.bf16.mxu1 %v692_v30  ;;  %v696_v43 = vpack.c.bf16 %v310_v40, %v308_v39  ;;  %v245_v44 = vld [vmem:[#allocation7 + $0x78] sm:$0xff]  ;;  %v309_v46 = vld [vmem:[#allocation7 + $0x270] sm:$0xff]  ;;  %v242_v48 = vld [vmem:[#allocation7 + $0x60] sm:$0xff]  ;;  %p961_p8 = pneg %p960_p6  ;;  %p967_p0 = por %p966_p11, %p965_p12 }
  0x65   : > { %757 = vmatprep.subr.bf16.mxu0 %v756_v34  ;;  %v760_v47 = vpack.c.bf16 %v245_v44, %v243_v41  ;;  %v244_v49 = vld [vmem:[#allocation7 + $0x70] sm:$0xff]  ;;  %v312_v50 = vld [vmem:[#allocation7 + $0x288] sm:$0xff]  ;;  %v314_v51 = vld [vmem:[#allocation7 + $0x298] sm:$0xff]  ;;  %v698_v54 = vpack.c.bf16 %v309_v46, %v307_v45 }
  0x66   : > { %v247_v52 = vld [vmem:[#allocation7 + $0x88] sm:$0xff]  ;;  %v249_v53 = vld [vmem:[#allocation7 + $0x98] sm:$0xff]  ;;  %v762_v55 = vpack.c.bf16 %v244_v49, %v242_v48  ;;  %v700_v56 = vpack.c.bf16 %v314_v51, %v312_v50  ;;  %v311_v57 = vld [vmem:[#allocation7 + $0x280] sm:$0xff]  ;;  %p968_p5 = pnand %p967_p0, %p961_p8 }
  0x67   : > { %695 = vmatpush1.bf16.msra.mxu1 %v694_v38  ;;  %v313_v58 = vld [vmem:[#allocation7 + $0x290] sm:$0xff]  ;;  %v246_v59 = vld [vmem:[#allocation7 + $0x80] sm:$0xff]  ;;  %v764_v60 = vpack.c.bf16 %v249_v53, %v247_v52  ;;  %v316_v62 = vld [vmem:[#allocation7 + $0x2a8] sm:$0xff] }
  0x68   : > { %759 = vmatpush1.bf16.msra.mxu0 %v758_v42  ;;  %697 = vmatprep.subr.bf16.mxu1 %v696_v43  ;;  %v248_v61 = vld [vmem:[#allocation7 + $0x90] sm:$0xff]  ;;  %v318_v63 = vld [vmem:[#allocation7 + $0x2b8] sm:$0xff]  ;;  %v251_v2 = vld [vmem:[#allocation7 + $0xa8] sm:$0xff]  ;;  %v702_v4 = vpack.c.bf16 %v313_v58, %v311_v57 }
  0x69   : > { %761 = vmatprep.subr.bf16.mxu0 %v760_v47  ;;  %v253_v3 = vld [vmem:[#allocation7 + $0xb8] sm:$0xff]  ;;  %v766_v5 = vpack.c.bf16 %v248_v61, %v246_v59  ;;  %v704_v6 = vpack.c.bf16 %v318_v63, %v316_v62  ;;  %v315_v7 = vld [vmem:[#allocation7 + $0x2a0] sm:$0xff]  ;;  %v317_v8 = vld [vmem:[#allocation7 + $0x2b0] sm:$0xff] }
  0x6a   : > { %v250_v9 = vld [vmem:[#allocation7 + $0xa0] sm:$0xff]  ;;  %v768_v10 = vpack.c.bf16 %v253_v3, %v251_v2  ;;  %v252_v11 = vld [vmem:[#allocation7 + $0xb0] sm:$0xff]  ;;  %v320_v12 = vld [vmem:[#allocation7 + $0x2c8] sm:$0xff]  ;;  %v706_v16 = vpack.c.bf16 %v317_v8, %v315_v7 }
  0x6b   : > { %699 = vmatpush1.bf16.msra.mxu1 %v698_v54  ;;  %v322_v13 = vld [vmem:[#allocation7 + $0x2d8] sm:$0xff]  ;;  %v255_v14 = vld [vmem:[#allocation7 + $0xc8] sm:$0xff]  ;;  %v770_v17 = vpack.c.bf16 %v252_v11, %v250_v9  ;;  %v319_v19 = vld [vmem:[#allocation7 + $0x2c0] sm:$0xff] }
  0x6c   : > { %763 = vmatpush1.bf16.msra.mxu0 %v762_v55  ;;  %701 = vmatprep.subr.bf16.mxu1 %v700_v56  ;;  %v257_v15 = vld [vmem:[#allocation7 + $0xd8] sm:$0xff]  ;;  %v708_v18 = vpack.c.bf16 %v322_v13, %v320_v12  ;;  %v321_v20 = vld [vmem:[#allocation7 + $0x2d0] sm:$0xff]  ;;  %v254_v21 = vld [vmem:[#allocation7 + $0xc0] sm:$0xff] }
  0x6d   : > { %765 = vmatprep.subr.bf16.mxu0 %v764_v60  ;;  %v772_v22 = vpack.c.bf16 %v257_v15, %v255_v14  ;;  %v256_v23 = vld [vmem:[#allocation7 + $0xd0] sm:$0xff]  ;;  %v324_v24 = vld [vmem:[#allocation7 + $0x2e8] sm:$0xff]  ;;  %v326_v25 = vld [vmem:[#allocation7 + $0x2f8] sm:$0xff]  ;;  %v710_v28 = vpack.c.bf16 %v321_v20, %v319_v19 }
  0x6e   : > { %v259_v26 = vld [vmem:[#allocation7 + $0xe8] sm:$0xff]  ;;  %v261_v27 = vld [vmem:[#allocation7 + $0xf8] sm:$0xff]  ;;  %v774_v29 = vpack.c.bf16 %v256_v23, %v254_v21  ;;  %v712_v30 = vpack.c.bf16 %v326_v25, %v324_v24  ;;  %v323_v31 = vld [vmem:[#allocation7 + $0x2e0] sm:$0xff] }
  0x6f   : > { %703 = vmatpush1.bf16.msra.mxu1 %v702_v4  ;;  %v325_v32 = vld [vmem:[#allocation7 + $0x2f0] sm:$0xff]  ;;  %v258_v33 = vld [vmem:[#allocation7 + $0xe0] sm:$0xff]  ;;  %v776_v34 = vpack.c.bf16 %v261_v27, %v259_v26  ;;  %v328_v36 = vld [vmem:[#allocation7 + $0x308] sm:$0xff] }
  0x70   : > { %767 = vmatpush1.bf16.msra.mxu0 %v766_v5  ;;  %705 = vmatprep.subr.bf16.mxu1 %v704_v6  ;;  %v260_v35 = vld [vmem:[#allocation7 + $0xf0] sm:$0xff]  ;;  %v330_v37 = vld [vmem:[#allocation7 + $0x318] sm:$0xff]  ;;  %v263_v38 = vld [vmem:[#allocation7 + $0x108] sm:$0xff]  ;;  %v714_v40 = vpack.c.bf16 %v325_v32, %v323_v31 }
  0x71   : > { %769 = vmatprep.subr.bf16.mxu0 %v768_v10  ;;  %v265_v39 = vld [vmem:[#allocation7 + $0x118] sm:$0xff]  ;;  %v778_v41 = vpack.c.bf16 %v260_v35, %v258_v33  ;;  %v716_v42 = vpack.c.bf16 %v330_v37, %v328_v36  ;;  %v327_v43 = vld [vmem:[#allocation7 + $0x300] sm:$0xff]  ;;  %v329_v44 = vld [vmem:[#allocation7 + $0x310] sm:$0xff] }
  0x72   : > { %v262_v45 = vld [vmem:[#allocation7 + $0x100] sm:$0xff]  ;;  %v780_v46 = vpack.c.bf16 %v265_v39, %v263_v38  ;;  %v264_v47 = vld [vmem:[#allocation7 + $0x110] sm:$0xff]  ;;  %v332_v48 = vld [vmem:[#allocation7 + $0x328] sm:$0xff]  ;;  %v718_v52 = vpack.c.bf16 %v329_v44, %v327_v43 }
  0x73   : > { %707 = vmatpush1.bf16.msra.mxu1 %v706_v16  ;;  %v334_v49 = vld [vmem:[#allocation7 + $0x338] sm:$0xff]  ;;  %v267_v50 = vld [vmem:[#allocation7 + $0x128] sm:$0xff]  ;;  %v782_v53 = vpack.c.bf16 %v264_v47, %v262_v45  ;;  %v331_v55 = vld [vmem:[#allocation7 + $0x320] sm:$0xff] }
  0x74   : > { %771 = vmatpush1.bf16.msra.mxu0 %v770_v17  ;;  %709 = vmatprep.subr.bf16.mxu1 %v708_v18  ;;  %v269_v51 = vld [vmem:[#allocation7 + $0x138] sm:$0xff]  ;;  %v720_v54 = vpack.c.bf16 %v334_v49, %v332_v48  ;;  %v333_v56 = vld [vmem:[#allocation7 + $0x330] sm:$0xff]  ;;  %v266_v57 = vld [vmem:[#allocation7 + $0x120] sm:$0xff] }
  0x75   : > { %773 = vmatprep.subr.bf16.mxu0 %v772_v22  ;;  %v784_v58 = vpack.c.bf16 %v269_v51, %v267_v50  ;;  %v268_v59 = vld [vmem:[#allocation7 + $0x130] sm:$0xff]  ;;  %v336_v60 = vld [vmem:[#allocation7 + $0x348] sm:$0xff]  ;;  %v338_v61 = vld [vmem:[#allocation7 + $0x358] sm:$0xff]  ;;  %v722_v2 = vpack.c.bf16 %v333_v56, %v331_v55 }
  0x76   : > { %v271_v62 = vld [vmem:[#allocation7 + $0x148] sm:$0xff]  ;;  %v273_v63 = vld [vmem:[#allocation7 + $0x158] sm:$0xff]  ;;  %v786_v3 = vpack.c.bf16 %v268_v59, %v266_v57  ;;  %v724_v4 = vpack.c.bf16 %v338_v61, %v336_v60  ;;  %v335_v5 = vld [vmem:[#allocation7 + $0x340] sm:$0xff] }
  0x77   : > { %711 = vmatpush1.bf16.msra.mxu1 %v710_v28  ;;  %v337_v6 = vld [vmem:[#allocation7 + $0x350] sm:$0xff]  ;;  %v270_v7 = vld [vmem:[#allocation7 + $0x140] sm:$0xff]  ;;  %v788_v8 = vpack.c.bf16 %v273_v63, %v271_v62  ;;  %v340_v10 = vld [vmem:[#allocation7 + $0x368] sm:$0xff] }
  0x78   : > { %775 = vmatpush1.bf16.msra.mxu0 %v774_v29  ;;  %713 = vmatprep.subr.bf16.mxu1 %v712_v30  ;;  %v272_v9 = vld [vmem:[#allocation7 + $0x150] sm:$0xff]  ;;  %v342_v11 = vld [vmem:[#allocation7 + $0x378] sm:$0xff]  ;;  %v275_v12 = vld [vmem:[#allocation7 + $0x168] sm:$0xff]  ;;  %v726_v14 = vpack.c.bf16 %v337_v6, %v335_v5 }
  0x79   : > { %777 = vmatprep.subr.bf16.mxu0 %v776_v34  ;;  %v277_v13 = vld [vmem:[#allocation7 + $0x178] sm:$0xff]  ;;  %v339_v15 = vld [vmem:[#allocation7 + $0x360] sm:$0xff]  ;;  %v341_v16 = vld [vmem:[#allocation7 + $0x370] sm:$0xff]  ;;  %v790_v17 = vpack.c.bf16 %v272_v9, %v270_v7  ;;  %v728_v18 = vpack.c.bf16 %v342_v11, %v340_v10 }
  0x7a   : > { %v274_v19 = vld [vmem:[#allocation7 + $0x160] sm:$0xff]  ;;  %v276_v20 = vld [vmem:[#allocation7 + $0x170] sm:$0xff]  ;;  %v344_v21 = vld [vmem:[#allocation7 + $0x388] sm:$0xff]  ;;  %v792_v22 = vpack.c.bf16 %v277_v13, %v275_v12  ;;  %v730_v29 = vpack.c.bf16 %v341_v16, %v339_v15 }
  0x7b   : > { %715 = vmatpush1.bf16.msra.mxu1 %v714_v40  ;;  %v346_v23 = vld [vmem:[#allocation7 + $0x398] sm:$0xff]  ;;  %v279_v24 = vld [vmem:[#allocation7 + $0x188] sm:$0xff]  ;;  %v343_v30 = vld [vmem:[#allocation7 + $0x380] sm:$0xff]  ;;  %v794_v34 = vpack.c.bf16 %v276_v20, %v274_v19 }
  0x7c   : > { %779 = vmatpush1.bf16.msra.mxu0 %v778_v41  ;;  %717 = vmatprep.subr.bf16.mxu1 %v716_v42  ;;  %v201_v25 = vld [vmem:[#allocation2] sm:$0x3]  ;;  %v281_v26 = vld [vmem:[#allocation7 + $0x198] sm:$0xff]  ;;  %v202_v27 = vld [vmem:[#allocation3] sm:$0x3]  ;;  %v732_v35 = vpack.c.bf16 %v346_v23, %v344_v21 }
  0x7d   : > { %781 = vmatprep.subr.bf16.mxu0 %v780_v46  ;;  %v203_v28 = vld [vmem:[%s1222_s16] ss:$4 sm:$0x3]  ;;  %v672_v33 = vld [vmem:[%s1222_s16 + $0x1] ss:$4 sm:$0x3]  ;;  %v796_v39 = vpack.c.bf16 %v281_v26, %v279_v24 }
  0x7e   : > { %v204_v31 = vadd.f32 %v203_v28, %v201_v25  ;;  %v205_v32 = vmax.f32 %v202_v27, %v203_v28  ;;  %v345_v36 = vld [vmem:[#allocation7 + $0x390] sm:$0xff]  ;;  %v278_v37 = vld [vmem:[#allocation7 + $0x180] sm:$0xff]  ;;  %v348_v41 = vld [vmem:[#allocation7 + $0x3a8] sm:$0xff] }
  0x7f   : > { %719 = vmatpush1.bf16.msra.mxu1 %v718_v52  ;;  %v673_v38 = vld [vmem:[%s1222_s16 + $0x2] ss:$4 sm:$0x3]  ;;  %v283_v45 = vld [vmem:[#allocation7 + $0x1a8] sm:$0xff]  ;;  %v734_v48 = vpack.c.bf16 %v345_v36, %v343_v30  ;;  %v282_v55 = vld [vmem:[#allocation7 + $0x1a0] sm:$0xff] }
  0x80   : > { %783 = vmatpush1.bf16.msra.mxu0 %v782_v53  ;;  %721 = vmatprep.subr.bf16.mxu1 %v720_v54  ;;  %v280_v40 = vld [vmem:[#allocation7 + $0x190] sm:$0xff]  ;;  %v350_v42 = vld [vmem:[#allocation7 + $0x3b8] sm:$0xff]  ;;  %v208_v43 = vadd.f32 %v672_v33, %v204_v31  ;;  %v209_v44 = vmax.f32 %v205_v32, %v672_v33  ;;  %v347_v53 = vld [vmem:[#allocation7 + $0x3a0] sm:$0xff] }
  0x81   : > { %785 = vmatprep.subr.bf16.mxu0 %v784_v58  ;;  %v285_v46 = vld [vmem:[#allocation7 + $0x1b8] sm:$0xff]  ;;  %v798_v51 = vpack.c.bf16 %v280_v40, %v278_v37  ;;  %v736_v52 = vpack.c.bf16 %v350_v42, %v348_v41  ;;  %v349_v54 = vld [vmem:[#allocation7 + $0x3b0] sm:$0xff]  ;;  %v352_v58 = vld [vmem:[#allocation7 + $0x3c8] sm:$0xff] }
  0x82   : > { %v674_v47 = vld [vmem:[%s1222_s16 + $0x3] ss:$4 sm:$0x3]  ;;  %v212_v49 = vadd.f32 %v673_v38, %v208_v43  ;;  %v213_v50 = vmax.f32 %v209_v44, %v673_v38  ;;  %v800_v56 = vpack.c.bf16 %v285_v46, %v283_v45  ;;  %v287_v62 = vld [vmem:[#allocation7 + $0x1c8] sm:$0xff]  ;;  %v351_v6 = vld [vmem:[#allocation7 + $0x3c0] sm:$0xff] }
  0x83   : > { %723 = vmatpush1.bf16.msra.mxu1 %v722_v2  ;;  %v284_v57 = vld [vmem:[#allocation7 + $0x1b0] sm:$0xff]  ;;  %v354_v59 = vld [vmem:[#allocation7 + $0x3d8] sm:$0xff]  ;;  %v738_v2 = vpack.c.bf16 %v349_v54, %v347_v53  ;;  %v356_v11 = vld [vmem:[#allocation7 + $0x3e8] sm:$0xff]  ;;  %v1052_v45 = vmov 1966171168  }
  0x84   : > { %787 = vmatpush1.bf16.msra.mxu0 %v786_v3  ;;  %725 = vmatprep.subr.bf16.mxu1 %v724_v4  ;;  %v216_v60 = vadd.f32 %v674_v47, %v212_v49  ;;  %v217_v61 = vmax.f32 %v213_v50, %v674_v47  ;;  %v289_v63 = vld [vmem:[#allocation7 + $0x1d8] sm:$0xff]  ;;  %v1250_v3 = vshrl.u32 %v195_v0, 7  ;;  %v802_v4 = vpack.c.bf16 %v284_v57, %v282_v55  ;;  %v353_v7 = vld [vmem:[#allocation7 + $0x3d0] sm:$0xff]  ;;  %v291_v13 = vld [vmem:[#allocation7 + $0x1e8] sm:$0xff] }
  0x85   : > { %789 = vmatprep.subr.bf16.mxu0 %v788_v8  ;;  %v740_v5 = vpack.c.bf16 %v354_v59, %v352_v58  ;;  %v286_v8 = vld [vmem:[#allocation7 + $0x1c0] sm:$0xff]  ;;  %v804_v9 = vpack.c.bf16 %v289_v63, %v287_v62  ;;  %v288_v10 = vld [vmem:[#allocation7 + $0x1d0] sm:$0xff]  ;;  %v358_v12 = vld [vmem:[#allocation7 + $0x3f8] sm:$0xff]  ;;  %v742_v15 = vpack.c.bf16 %v353_v7, %v351_v6  ;;  %v539_v46 = vunpack.c.l.s4 %v1052_v45 }
  0x86   : > { %222 = vst.msk [vmem:[#allocation2] sm:$0x3] %vm1233_vm0, %v216_v60  ;;  %223 = vst.msk [vmem:[#allocation3] sm:$0x3] %vm1233_vm0, %v217_v61  ;;  %v366_v16 = vsub.s32 1, %v1250_v3  ;;  %v806_v0 = vpack.c.bf16 %v288_v10, %v286_v8  ;;  %v357_v19 = vld [vmem:[#allocation7 + $0x3f0] sm:$0xff] }
  0x87   : > { %727 = vmatpush1.bf16.msra.mxu1 %v726_v14  ;;  %v293_v14 = vld [vmem:[#allocation7 + $0x1f8] sm:$0xff]  ;;  %v290_v21 = vld [vmem:[#allocation7 + $0x1e0] sm:$0xff]  ;;  %v362_v24 = vsub.s32 0, %v1250_v3  ;;  %v540_v47 = vunpack.c.0.s8 %v539_v46 }
  0x88   : > { %791 = vmatpush1.bf16.msra.mxu0 %v790_v17  ;;  %729 = vmatprep.subr.bf16.mxu1 %v728_v18  ;;  %v744_v17 = vpack.c.bf16 %v358_v12, %v356_v11  ;;  %v355_v18 = vld [vmem:[#allocation7 + $0x3e0] sm:$0xff]  ;;  %v808_v20 = vpack.c.bf16 %v293_v14, %v291_v13 }
  0x89   : > { %793 = vmatprep.subr.bf16.mxu0 %v792_v22  ;;  %v292_v22 = vld [vmem:[#allocation7 + $0x1f0] sm:$0xff]  ;;  %v746_v26 = vpack.c.bf16 %v357_v19, %v355_v18  ;;  %v543_v49 = vsub.s32 %v540_v47, %v1250_v3 }
  0x8b   : > { %731 = vmatpush1.bf16.msra.mxu1 %v730_v29  ;;  %v810_v29 = vpack.c.bf16 %v292_v22, %v290_v21 }
  0x8c   : > { %795 = vmatpush1.bf16.msra.mxu0 %v794_v34  ;;  %733 = vmatprep.subr.bf16.mxu1 %v732_v35 }
  0x8d   : > { %797 = vmatprep.subr.bf16.mxu0 %v796_v39  ;;  %v229_v23 = vld [vmem:[#allocation3] sm:$0x3]  ;;  %v227_v25 = vld [vmem:[#allocation2] sm:$0x3] }
  0x8e   : > { %v367_v27 = vrot.slane %v229_v23, %v366_v16  ;;  %v228_v28 = vmul.f32 0.25, %v227_v25  ;;  %v363_v31 = vrot.slane %v229_v23, %v362_v24 }
  0x8f   : > { %735 = vmatpush1.bf16.msra.mxu1 %v734_v48 }
  0x90   : > { %799 = vmatpush1.bf16.msra.mxu0 %v798_v51  ;;  %737 = vmatprep.subr.bf16.mxu1 %v736_v52  ;;  %v449_v30 = vrot.slane %v228_v28, %v366_v16  ;;  %v445_v32 = vrot.slane %v228_v28, %v362_v24 }
  0x91   : > { %801 = vmatprep.subr.bf16.mxu0 %v800_v56  ;;  %434 = vmatprep.mubr.f32.mxu1 %v367_v27 }
  0x92   : > { %516 = vmatprep.mubr.f32.mxu0 %v449_v30 }
  0x93   : > { %739 = vmatpush1.bf16.msra.mxu1 %v738_v2 }
  0x94   : > { %803 = vmatpush1.bf16.msra.mxu0 %v802_v4  ;;  %741 = vmatprep.subr.bf16.mxu1 %v740_v5 }
  0x95   : > { %805 = vmatprep.subr.bf16.mxu0 %v804_v9 }
  0x97   : > { %743 = vmatpush1.bf16.msra.mxu1 %v742_v15 }
  0x98   : > { %807 = vmatpush1.bf16.msra.mxu0 %v806_v0  ;;  %745 = vmatprep.subr.bf16.mxu1 %v744_v17 }
  0x99   : > { %809 = vmatprep.subr.bf16.mxu0 %v808_v20 }
  0x9b   : > { %747 = vmatpush1.bf16.msra.mxu1 %v746_v26 }
  0x9c   : > { %811 = vmatpush1.bf16.msra.mxu0 %v810_v29 }
  0x9e   : > { %435 = vmatmul.mubr.f32.vlgmr.msra.gmra.mrb[0].mxu1 %v363_v31 }
  0x9f   : > { %517 = vmatmul.mubr.f32.vlgmr.msra.gmra.mrb[0].mxu0 %v445_v32 }
 0x171   : > { %v436_v33 = vpop.f32.mrb[0].mxu1 }
 0x172   : > { %v518_v34 = vpop.f32.mrb[0].mxu0  ;;  %v438_v35 = vpop.f32.mrb[1].mxu1 }
 0x173   : > { %v519_v36 = vadd.f32 %v518_v34, %v436_v33  ;;  %v520_v37 = vpop.f32.mrb[1].mxu0 }
 0x174   : > { %v521_v38 = vadd.f32 %v520_v37, %v438_v35 }
 0x175   : > { %v675_v39 = vmul.f32 -1.442695, %v519_v36 }
 0x176   : > { %v676_v40 = vmul.f32 -1.442695, %v521_v38 }
 0x177   : > { %892 = vpow2.f32 %v675_v39 }
 0x178   : > { %894 = vpow2.f32 %v676_v40 }
 0x181   : > { %v893_v41 = vpop.eup %892 }
 0x182   : > { %v895_v42 = vpop.eup %894  ;;  %v529_v43 = vadd.f32 1.0, %v893_v41 }
 0x183   : > { %v530_v44 = vadd.f32 1.0, %v895_v42 }
 0x184   : > { %896 = vrcp.f32 %v529_v43 }
 0x185   : > { %898 = vrcp.f32 %v530_v44 }
 0x18e   : > { %v897_v48 = vpop.eup %896 }
 0x18f   : > { %v899_v50 = vpop.eup %898 }
 0x190   : > { %v537_v51 = vcombine.low %v897_v48, %v899_v50 }
 0x192   : > { %v544_v52 = vrot.slane %v537_v51, %v543_v49 }
 0x194   : > { %v551_v53 = vrot.slane %v544_v52, %v543_v49 }
 0x196   : > { %553 = vst.msk [vmem:[%s190_s21] sm:$0x3] %vm1233_vm0, %v551_v53 }
 0x197   : > { %971 = shalt.err (!%p968_p5)
}
 0x198   : > { %s972_s29 = scalar_lea.hbm %s1260_s7, 32  ;;  %s976_s18 = scalar_lea.hbm %s1313_s2, 64 }
 0x199   : > { %p973_p9 = scmp.ne.s32.totalorder %s1260_s7, %s972_s29  ;;  %p977_p7 = scmp.lt.u32.totalorder %s1260_s7, %s1313_s2 }
 0x19a   : > { %p978_p3 = scmp.lt.u32.totalorder %s976_s18, %s972_s29  ;;  %p980_p4 = scmp.lt.u32.totalorder %s972_s29, %s1260_s7 }
 0x19b   : > { %p974_p1 = pnand %p973_p9, %p1165_p10 }
 0x19c   : > { %p979_p13 = por %p978_p3, %p977_p7 }
 0x19d   : > { %p975_p2 = pneg %p974_p1 }
 0x19e   : > { %p981_p6 = por %p980_p4, %p979_p13 }
 0x1a0   : > { %p982_p8 = pnand %p981_p6, %p975_p2 }
 0x1a2   : > { %985 = shalt.err (!%p982_p8)
}
 0x1a3   : > { %820 = dma.vmem_to_hbm [thread:$0]  (%p1165_p10), %s1262_s4, 32, %s1260_s7, %s555_s24  }
 0x1a4 PF: > { %s581_s16 = sand.u32 1, %s1024_s9   ;;  %p1333_p12 = scmp.ne.s32.totalorder %s1321_s20, 0 }
 0x1a5   : > { %p1334_p11 = scmp.ge.s32.totalorder %s1044_s14, 2  ;;  %s582_s17 = scalar_lea.sflag [#allocation6], %s581_s16 }
 0x1a7   : > { %p831_p0 = pnand %p1334_p11, %p1333_p12 }
 0x1a9   : > { %1019 = dma.done.wait (!%p831_p0), %s582_s17, 32  }
 0x1aa   : > { %1021 = vsyncadd (!%p831_p0), %s582_s17, 4294967264  ;;  %s19_s14 = sadd.s32 1, %s1044_s14   ;;  %s1335_s9 = smov %s1028_s10 }
 0x1ab   : > { %p16_p5 = scmp.ge.s32.totalorder %s19_s14, 4   ;;  %s1336_s10 = smov %s1032_s11 }
 0x1ac   : > { %s1337_s11 = smov %s1174_s28  ;;  %s1338_s12 = smov %s1040_s13 }
 0x1ad   : > { %s1339_s13 = smov %s1341_s25  ;;  %18 = sbr.rel (!%p16_p5) target bundleno = 7 (0x7), region = 89 }
 0x1b4   :  { %587 = vsyncpa [#allocation5], 1 }
 0x1b5   :  { %589 = vsyncpa [#allocation5 + $0x1], 1 }
 0x1b6   :  { %590 = vsyncpa [#allocation8], 1 }
 0x1b7   :  { %591 = vsyncpa [#allocation6], 1 }
 0x1b8   :  { %593 = vsyncpa [#allocation6 + $0x1], 1 }

</bundles_post_ra>
